<compile_context>
chip_gen: v7x
topology: tpu7x:2x2x1
jax: 0.10.0
libtpu: 0.0.40
codegen_flags: <defaults>
</compile_context>

<pallas_src>
import functools

import jax
import jax.numpy as jnp
from jax.experimental import pallas as pl
from jax.experimental.pallas import tpu as pltpu


def _focal_loss_kernel(*refs, gamma, ignore_index, n_rows, tile_rows, n_inner,
                       has_alpha):
    if has_alpha:
        x_ref, t_ref, w_ref, out_ref = refs
    else:
        x_ref, t_ref, out_ref = refs
        w_ref = None

    o = pl.program_id(0)          # parallel group (maps to a TensorCore on v7x)
    i = pl.program_id(1)          # reduction step within the group

    @pl.when(i == 0)
    def _():
        out_ref[...] = jnp.zeros_like(out_ref)

    # Natural-layout (TN, C) tile -> lane-dense (C, TN) via one in-kernel transpose
    # (XLU / vector-extended slot; overlapped with the next tile's DMA).
    xt = jnp.transpose(x_ref[...].astype(jnp.float32))         # (C, TN) f32
    t = t_ref[...]                                              # (1, TN) int32
    tn = xt.shape[1]

    # In-kernel remainder / padded-step masking (replaces wrapper-side jnp.pad).
    row0 = (o * n_inner + i) * tile_rows
    rows = row0 + jax.lax.broadcasted_iota(jnp.int32, (1, tn), 1)
    valid = (t != ignore_index) & (rows < n_rows)

    # log-sum-exp over classes (sublane axis) -> (1, TN)
    m = jnp.max(xt, axis=0, keepdims=True)
    lse = m + jnp.log(jnp.sum(jnp.exp(xt - m), axis=0, keepdims=True))

    # Target-class gather via one-hot select over the C sublanes (VPU/XLU; C=9 is far
    # too small to be worth routing through the MXU).
    onehot = jax.lax.broadcasted_iota(jnp.int32, xt.shape, 0) == t   # (C, TN)
    if has_alpha:
        # fused gather: w[t] * (lse - x[t]) in a single select + sublane-reduce pass
        w = w_ref[...].astype(jnp.float32)                      # (C, 1)
        ce_raw = jnp.sum(jnp.where(onehot, w * (lse - xt), 0.0),
                         axis=0, keepdims=True)
    else:
        x_t = jnp.sum(jnp.where(onehot, xt, 0.0), axis=0, keepdims=True)
        ce_raw = lse - x_t
    ce = jnp.where(valid, ce_raw, 0.0)       # torch: ce == 0 at ignore_index / padding

    pt = jnp.exp(-ce)
    base = 1.0 - pt        # ce >= 0  ==>  pt <= 1  ==>  base >= 0 (no clamp needed)

    g = float(gamma)
    if g == 0.0:
        powed = jnp.ones_like(base)
    elif g.is_integer() and 1.0 <= g <= 8.0:
        # fast path (default gamma = 2.0): repeated multiply, no EUP transcendentals
        powed = base
        for _ in range(int(g) - 1):
            powed = powed * base
    else:
        # fractional (or very large integer) gamma: exp(g*log(base)), guarded at 0
        pos = base > 0.0
        powed = jnp.where(pos, jnp.exp(g * jnp.log(jnp.where(pos, base, 1.0))), 0.0)

    out_ref[...] += (powed * ce)[None]       # (1, 1, TN) per-row partial contributions


def _round_up(a, b):
    return (a + b - 1) // b * b


def focal_loss(logits, target, *, alpha=None, gamma=2.0, ignore_index=-100,
               block_rows=16384):
    """Pallas TPU implementation of FocalLoss.forward. Returns a scalar float32."""
    c = logits.shape[-1]
    x = logits.reshape(-1, c)                # (N, C): free reshape, keeps input dtype
    t = target.reshape(-1).astype(jnp.int32)
    n = x.shape[0]

    # Row tile: a (TN, C) block is one contiguous HBM read. TN multiple of 128 keeps the
    # (1, TN) target / iota blocks lane-aligned; small inputs use one full-array block.
    if n <= block_rows:
        tn = n
        n_steps = 1
    else:
        tn = _round_up(min(int(block_rows), n), 128)
        n_steps = pl.cdiv(n, tn)

    # 2-D grid: outer "parallel" groups (both TensorCores on v7x), inner "arbitrary"
    # reduction axis. Odd n_steps gives one extra step that is fully masked in-kernel.
    n_outer = 1 if n_steps == 1 else 2
    n_inner = (n_steps + n_outer - 1) // n_outer
    last_blk = n_steps - 1

    def _row_block(o, i):
        # clamp so the DMA never targets a fully out-of-range block (the kernel masks
        # the logical rows anyway, so clamped re-reads contribute exactly 0)
        return jnp.minimum(o * n_inner + i, last_blk)

    t_1n = t.reshape(1, n)

    has_alpha = alpha is not None
    args = [x, t_1n]
    in_specs = [
        pl.BlockSpec((tn, c), lambda o, i: (_row_block(o, i), 0)),   # logits rows
        pl.BlockSpec((1, tn), lambda o, i: (0, _row_block(o, i))),   # targets
    ]
    if has_alpha:
        w = jnp.asarray(alpha, dtype=jnp.float32).reshape(c, 1)
        args.append(w)
        in_specs.append(pl.BlockSpec((c, 1), lambda o, i: (0, 0)))

    kernel = functools.partial(
        _focal_loss_kernel,
        gamma=float(gamma),
        ignore_index=int(ignore_index),
        n_rows=int(n),
        tile_rows=int(tn),
        n_inner=int(n_inner),
        has_alpha=has_alpha,
    )

    itemsize = jnp.dtype(x.dtype).itemsize
    cost = pl.CostEstimate(
        flops=int(70 * n),                                   # ~lane-ops per row
        transcendentals=int(n * (c + 2)),
        bytes_accessed=int(n * c * itemsize + 4 * n + n_outer * tn * 4),
    )

    partial_sums = pl.pallas_call(
        kernel,
        out_shape=jax.ShapeDtypeStruct((n_outer, 1, tn), jnp.float32),
        grid=(n_outer, n_inner),
        in_specs=in_specs,
        out_specs=pl.BlockSpec((1, 1, tn), lambda o, i: (o, 0, 0)),
        compiler_params=pltpu.CompilerParams(
            dimension_semantics=("parallel", "arbitrary"),
            vmem_limit_bytes=48 * 1024 * 1024,   # stays within v7x's 64 MiB physical
        ),
        cost_estimate=cost,
    )(*args)

    # mean over ALL rows (ignored / padded rows contributed exactly 0)
    return jnp.sum(partial_sums) * jnp.float32(1.0 / n)


def _focal_loss_ref(logits, target, *, alpha=None, gamma=2.0, ignore_index=-100):
    """Pure-JAX reference (mirrors torch F.cross_entropy + focal formula, incl. alpha)."""
    c = logits.shape[-1]
    x = logits.reshape(-1, c).astype(jnp.float32)
    t = target.reshape(-1)
    lse = jax.scipy.special.logsumexp(x, axis=-1)
    safe_t = jnp.clip(t, 0, c - 1)
    x_t = jnp.take_along_axis(x, safe_t[:, None], axis=-1)[:, 0]
    nll = lse - x_t
    if alpha is not None:
        w = jnp.asarray(alpha, jnp.float32)
        nll = w[safe_t] * nll
    ce = jnp.where(t != ignore_index, nll, 0.0)
    pt = jnp.exp(-ce)
    return jnp.mean((1.0 - pt) ** gamma * ce)


if __name__ == "__main__":
    keys = jax.random.split(jax.random.PRNGKey(0), 6)
    num_labels = 9

    # --- test 1: small NER-like shapes (batch=2, seq=8), no alpha, single tile ---
    batch, seq = 2, 8
    logits = jax.random.normal(keys[0], (batch, seq, num_labels), dtype=jnp.float32)
    target = jax.random.randint(keys[1], (batch, seq), 0, num_labels, dtype=jnp.int32)
    target = jnp.where(jax.random.bernoulli(keys[2], 0.25, (batch, seq)), -100, target)

    loss = jax.block_until_ready(focal_loss(logits, target, gamma=2.0))
    ref = jax.block_until_ready(_focal_loss_ref(logits, target, gamma=2.0))
    assert jnp.allclose(loss, ref, atol=1e-5, rtol=1e-4), (loss, ref)

    # --- test 2: class-weight (alpha) path and fractional-gamma path ---
    alpha = jnp.linspace(0.5, 1.5, num_labels, dtype=jnp.float32)
    loss_a = jax.block_until_ready(focal_loss(logits, target, alpha=alpha, gamma=2.0))
    ref_a = jax.block_until_ready(_focal_loss_ref(logits, target, alpha=alpha, gamma=2.0))
    assert jnp.allclose(loss_a, ref_a, atol=1e-5, rtol=1e-4), (loss_a, ref_a)

    loss_g = jax.block_until_ready(focal_loss(logits, target, gamma=1.5))
    ref_g = jax.block_until_ready(_focal_loss_ref(logits, target, gamma=1.5))
    assert jnp.allclose(loss_g, ref_g, atol=1e-5, rtol=1e-4), (loss_g, ref_g)

    # --- test 3: multi-tile 2-D grid with a ragged tail and a fully-masked pad step ---
    batch2, seq2 = 3, 100    # N = 300 rows, TN = 128 -> 3 real steps, grid (2, 2)
    logits2 = jax.random.normal(keys[3], (batch2, seq2, num_labels), dtype=jnp.float32)
    target2 = jax.random.randint(keys[4], (batch2, seq2), 0, num_labels, dtype=jnp.int32)
    target2 = jnp.where(jax.random.bernoulli(keys[5], 0.25, (batch2, seq2)), -100, target2)

    loss2 = jax.block_until_ready(
        focal_loss(logits2, target2, gamma=2.0, block_rows=128))
    ref2 = jax.block_until_ready(_focal_loss_ref(logits2, target2, gamma=2.0))
    assert jnp.allclose(loss2, ref2, atol=1e-5, rtol=1e-4), (loss2, ref2)

    print("KERNEL_OK")
</pallas_src>

<mosaic_0001>
module attributes {stable_mosaic.version = 11 : i64} {
  func.func @_focal_loss_kernel(%arg0: i32, %arg1: i32, %arg2: memref<16x9xf32, #tpu.memory_space<vmem>>, %arg3: memref<1x16xi32, #tpu.memory_space<vmem>>, %arg4: memref<1x1x16xf32, #tpu.memory_space<vmem>>) attributes {dimension_semantics = [#tpu.dimension_semantics<parallel>, #tpu.dimension_semantics<arbitrary>], iteration_bounds = array<i64: 1, 1>, scalar_prefetch = 0 : i64, scratch_operands = 0 : i64, tpu.core_type = #tpu.core_type<tc>, window_params = [{transform_indices = @transform_0, window_bounds = array<i64: 16, 9>}, {transform_indices = @transform_1, window_bounds = array<i64: 1, 16>}, {transform_indices = @transform_2, window_bounds = array<i64: 1, 1, 16>}]} {
    %c0_i32 = arith.constant 0 : i32
    %0 = arith.cmpi eq, %arg1, %c0_i32 : i32
    %1 = arith.extui %0 : i1 to i32
    %c0_i32_0 = arith.constant 0 : i32
    %2 = arith.cmpi ne, %1, %c0_i32_0 : i32
    scf.if %2 {
      %cst_17 = arith.constant 0.000000e+00 : f32
      %47 = vector.broadcast %cst_17 : f32 to vector<1x1x16xf32>
      %c0_18 = arith.constant 0 : index
      %c0_19 = arith.constant 0 : index
      %c0_20 = arith.constant 0 : index
      %48 = vector.load %arg4[%c0_18, %c0_19, %c0_20] : memref<1x1x16xf32, #tpu.memory_space<vmem>>, vector<1x1x16xf32>
      tpu.vector_store %arg4[%c0_18, %c0_19, %c0_20], %47 {strides = array<i32>} : memref<1x1x16xf32, #tpu.memory_space<vmem>>, vector<1x1x16xf32>,
    } else {
    }
    %c0 = arith.constant 0 : index
    %c0_1 = arith.constant 0 : index
    %3 = vector.load %arg2[%c0, %c0_1] : memref<16x9xf32, #tpu.memory_space<vmem>>, vector<16x9xf32>
    %4 = tpu.transpose %3, [1, 0] : vector<16x9xf32> -> vector<9x16xf32>
    %c0_2 = arith.constant 0 : index
    %c0_3 = arith.constant 0 : index
    %5 = vector.load %arg3[%c0_2, %c0_3] : memref<1x16xi32, #tpu.memory_space<vmem>>, vector<1x16xi32>
    %c1_i32 = arith.constant 1 : i32
    %6 = arith.muli %arg0, %c1_i32 : i32
    %7 = arith.addi %6, %arg1 : i32
    %c16_i32 = arith.constant 16 : i32
    %8 = arith.muli %7, %c16_i32 : i32
    %9 = tpu.iota {dimensions = array<i32: 1>} : vector<1x16xi32>
    %10 = vector.broadcast %8 : i32 to vector<1x16xi32>
    %11 = arith.addi %10, %9 : vector<1x16xi32>
    %c-100_i32 = arith.constant -100 : i32
    %12 = vector.broadcast %c-100_i32 : i32 to vector<1x16xi32>
    %13 = arith.cmpi ne, %5, %12 : vector<1x16xi32>
    %c16_i32_4 = arith.constant 16 : i32
    %14 = vector.broadcast %c16_i32_4 : i32 to vector<1x16xi32>
    %15 = arith.cmpi slt, %11, %14 : vector<1x16xi32>
    %16 = arith.andi %13, %15 : vector<1x16xi1>
    %cst = arith.constant dense<0xFF800000> : vector<16xf32>
    %17 = vector.multi_reduction <maximumf>, %4, %cst [0] : vector<9x16xf32> to vector<16xf32>
    %18 = vector.shape_cast %17 : vector<16xf32> to vector<1x16xf32>
    %19 = vector.broadcast %18 : vector<1x16xf32> to vector<9x16xf32>
    %20 = arith.subf %4, %19 : vector<9x16xf32>
    %21 = math.exp %20 : vector<9x16xf32>
    %cst_5 = arith.constant dense<0.000000e+00> : vector<16xf32>
    %22 = vector.multi_reduction <add>, %21, %cst_5 [0] : vector<9x16xf32> to vector<16xf32>
    %23 = vector.shape_cast %22 : vector<16xf32> to vector<1x16xf32>
    %24 = math.log %23 : vector<1x16xf32>
    %25 = arith.addf %18, %24 : vector<1x16xf32>
    %26 = tpu.iota {dimensions = array<i32: 0>} : vector<9x16xi32>
    %27 = vector.broadcast %5 : vector<1x16xi32> to vector<9x16xi32>
    %28 = arith.cmpi eq, %26, %27 : vector<9x16xi32>
    %cst_6 = arith.constant 0.000000e+00 : f32
    %29 = vector.broadcast %cst_6 : f32 to vector<9x16xf32>
    %30 = arith.select %28, %4, %29 : vector<9x16xi1>, vector<9x16xf32>
    %cst_7 = arith.constant dense<0.000000e+00> : vector<16xf32>
    %31 = vector.multi_reduction <add>, %30, %cst_7 [0] : vector<9x16xf32> to vector<16xf32>
    %32 = vector.shape_cast %31 : vector<16xf32> to vector<1x16xf32>
    %33 = arith.subf %25, %32 : vector<1x16xf32>
    %cst_8 = arith.constant 0.000000e+00 : f32
    %34 = vector.broadcast %cst_8 : f32 to vector<1x16xf32>
    %35 = arith.select %16, %33, %34 : vector<1x16xi1>, vector<1x16xf32>
    %cst_9 = arith.constant 0.000000e+00 : f32
    %36 = vector.broadcast %cst_9 : f32 to vector<1x16xf32>
    %37 = arith.subf %36, %35 : vector<1x16xf32>
    %38 = math.exp %37 : vector<1x16xf32>
    %cst_10 = arith.constant 1.000000e+00 : f32
    %39 = vector.broadcast %cst_10 : f32 to vector<1x16xf32>
    %40 = arith.subf %39, %38 : vector<1x16xf32>
    %41 = arith.mulf %40, %40 : vector<1x16xf32>
    %c0_11 = arith.constant 0 : index
    %c0_12 = arith.constant 0 : index
    %c0_13 = arith.constant 0 : index
    %42 = vector.load %arg4[%c0_11, %c0_12, %c0_13] : memref<1x1x16xf32, #tpu.memory_space<vmem>>, vector<1x1x16xf32>
    %43 = arith.mulf %41, %35 : vector<1x16xf32>
    %44 = vector.shape_cast %43 : vector<1x16xf32> to vector<1x1x16xf32>
    %45 = arith.addf %42, %44 : vector<1x1x16xf32>
    %c0_14 = arith.constant 0 : index
    %c0_15 = arith.constant 0 : index
    %c0_16 = arith.constant 0 : index
    %46 = vector.load %arg4[%c0_14, %c0_15, %c0_16] : memref<1x1x16xf32, #tpu.memory_space<vmem>>, vector<1x1x16xf32>
    tpu.vector_store %arg4[%c0_14, %c0_15, %c0_16], %45 {strides = array<i32>} : memref<1x1x16xf32, #tpu.memory_space<vmem>>, vector<1x1x16xf32>,
    return
  }
  func.func @transform_0(%arg0: i32, %arg1: i32) -> (i32, i32) {
    %c1_i32 = arith.constant 1 : i32
    %0 = arith.muli %arg0, %c1_i32 : i32
    %1 = arith.addi %0, %arg1 : i32
    %c0_i32 = arith.constant 0 : i32
    %2 = arith.minsi %1, %c0_i32 : i32
    %c0_i32_0 = arith.constant 0 : i32
    %c0_i32_1 = arith.constant 0 : i32
    return %2, %c0_i32_0 : i32, i32
  }
  func.func @transform_1(%arg0: i32, %arg1: i32) -> (i32, i32) {
    %c1_i32 = arith.constant 1 : i32
    %0 = arith.muli %arg0, %c1_i32 : i32
    %1 = arith.addi %0, %arg1 : i32
    %c0_i32 = arith.constant 0 : i32
    %2 = arith.minsi %1, %c0_i32 : i32
    %c0_i32_0 = arith.constant 0 : i32
    %c0_i32_1 = arith.constant 0 : i32
    return %c0_i32_0, %2 : i32, i32
  }
  func.func @transform_2(%arg0: i32, %arg1: i32) -> (i32, i32, i32) {
    %c0_i32 = arith.constant 0 : i32
    %c0_i32_0 = arith.constant 0 : i32
    %c0_i32_1 = arith.constant 0 : i32
    return %arg0, %c0_i32, %c0_i32_0 : i32, i32, i32
  }
}

</mosaic_0001>

<bundles_post_ra>
// kernel: tpu_custom_call.1
= control target key start
LH: loop header
LB: loop body
LE: loop exit
PB: predicated region body
PF: predicated region fallthrough
CT: control target
= control target key end

     0   :  { %7 = vsyncpa [#allocation3], 0  ;;  %s306_s0 = inlined_call_operand.hbm [shape: f32[16,9], index: 0, kind: input, shape index: {}]   ;;  %s307_s1 = inlined_call_operand.vmem [shape: s32[1,16], index: 1, kind: input, shape index: {}]   ;;  %s308_s2 = inlined_call_operand.hbm [shape: f32[1,1,16], index: 2, kind: output, shape index: {}]  }
   0x1   :  { %8 = vsyncpa [#allocation4], 0  ;;  %s251_s9 = smov [#allocation2]   ;;  %s203_s13 = scalar_lea.hbm %s306_s0, 256 }
   0x2   :  { %s20_s10 = sshll.u32 %s251_s9, 4  ;;  %p204_p0 = scmp.ne.s32.totalorder %s306_s0, %s203_s13  ;;  %s21_s10 = int_to_ptr.vmem [resolvable:$true] %s20_s10 }
   0x3   :  { %p207_p1 = scmp.lt.u32.totalorder %s203_s13, %s306_s0 }
   0x5   :  { %p209_p2 = pnand %p207_p1, %p204_p0 }
   0x7   :  { %212 = shalt.err (!%p209_p2)
}
   0x8   :  { %s213_s18 = scalar_lea.vmem %s21_s10, 256  ;;  %p218_p4 = scmp.lt.s32.totalorder %s21_s10, %s21_s10 }
   0x9   :  { %p214_p3 = scmp.ne.s32.totalorder %s21_s10, %s213_s18  ;;  %p219_p5 = scmp.lt.s32.totalorder %s213_s18, %s213_s18 }
   0xb   :  { %p220_p6 = por %p219_p5, %p218_p4 }
   0xd   :  { %p221_p7 = pnand %p220_p6, %p214_p3 }
   0xf   :  { %224 = shalt.err (!%p221_p7)
}
  0x10   :  { %s252_s19 = smov 128   ;;  %s253_s20 = smov 8  }
  0x11   :  { %26 = dma.hbm_to_vmem [thread:$0]  %s306_s0, 256, %s21_s10, [#allocation3], %s252_s19, %s252_s19, %s253_s20  }
  0x12   :  { %247 = dma.done.wait [#allocation3], 256  }
  0x13   :  { %248 = vsyncadd [#allocation3], 4294967040  ;;  %v66_v0 = vld [vmem:[#allocation2] sm:$0xff]  ;;  %v67_v1 = vld [vmem:[#allocation2 + $0x8] sm:$0xff]  ;;  %vm64_vm0 = vcmask 122880   ;;  %v254_v2 = vmov 0.0   ;;  %v103_v13 = vlaneseq }
  0x14   :  { %68 = vxpose.xlu0.b32.start [1/2] (short) (narrow) %v66_v0, 16  ;;  %65 = vst.msk [vmem:[#allocation5] sm:$0x1] %vm64_vm0, %v254_v2  ;;  %vm110_vm1 = vcmask 130048   ;;  %v100_v21 = vld [vmem:[%s307_s1] sm:$0x1] }
  0x15   :  { %v140_v17 = vshrl.u32 %v103_v13, 7  ;;  %v104_v44 = vand.u32 127, %v103_v13  ;;  %vm107_vm4 = vcmp.ne.s32.totalorder %v100_v21, 4294967196  ;;  %s255_s1 = smov [#allocation5]  }
  0x16   :  { %s176_s24 = sshll.u32 %s255_s1, 4  ;;  %s177_s24 = int_to_ptr.vmem [resolvable:$true] %s176_s24 }
  0x17   :  { %v144_v20 = vsub.s32 0, %v140_v17  ;;  %v141_v22 = vadd.s32 8, %v140_v17  ;;  %vm108_vm5 = vcmp.lt.s32.totalorder %v104_v44, 16  ;;  %s225_s25 = scalar_lea.vmem %s177_s24, 16  ;;  %s229_s26 = scalar_lea.vmem %s177_s24, 32 }
  0x18   :  { %69 = vxpose.xlu0.b32.end [2/2] (short) (narrow) %v67_v1, 16  ;;  %vm109_vm6 = vmand %vm107_vm4, %vm108_vm5  ;;  %p226_p8 = scmp.ne.s32.totalorder %s177_s24, %s225_s25  ;;  %p230_p9 = scmp.lt.s32.totalorder %s177_s24, %s177_s24 }
  0x19   :  { %v145_v23 = vrot.slane %v100_v21, %v144_v20  ;;  %p231_p10 = scmp.lt.s32.totalorder %s229_s26, %s225_s25 }
  0x1b   :  { %vm147_vm2 = vcmp.eq.s32.totalorder %v141_v22, %v145_v23  ;;  %vm146_vm3 = vcmp.eq.s32.totalorder %v140_v17, %v145_v23  ;;  %v166_v57 = vld [vmem:[#allocation5] sm:$0x1]  ;;  %p232_p11 = por %p231_p10, %p230_p9 }
  0x1d   :  { %p233_p12 = pnand %p232_p11, %p226_p8 }
  0x94   :  { %v84_v3 = vpop.trf.xlu0 }
  0x95   :  { %v111_v5 = vsel %vm110_vm1, %v84_v3, -inf  ;;  %v148_v28 = vsel %vm146_vm3, %v84_v3, 0.0 }
  0x96   :  { %v150_v32 = vsel %vm110_vm1, %v148_v28, 0.0 }
  0x98   :  { %v85_v4 = vpop.trf.xlu0 }
  0x99   :  { %v113_v6 = vsel %vm64_vm0, %v85_v4, -inf  ;;  %v149_v25 = vsel %vm147_vm2, %v85_v4, 0.0 }
  0x9a   :  { %v114_v7 = vmax.f32 %v111_v5, %v113_v6  ;;  %v151_v31 = vsel %vm64_vm0, %v149_v25, 0.0 }
  0x9b   :  { %v152_v34 = vadd.f32 %v151_v31, %v150_v32 }
  0x9c   :  { %v115_v8 = vrot.slane %v114_v7, 4 }
  0x9d   :  { %v153_v37 = vrot.slane %v152_v34, 4 }
  0x9e   :  { %v116_v9 = vmax.f32 %v114_v7, %v115_v8 }
  0x9f   :  { %v154_v40 = vadd.f32 %v153_v37, %v152_v34 }
  0xa0   :  { %v117_v10 = vrot.slane %v116_v9, 2 }
  0xa1   :  { %v155_v42 = vrot.slane %v154_v40, 2 }
  0xa2   :  { %v118_v11 = vmax.f32 %v116_v9, %v117_v10 }
  0xa3   :  { %v156_v43 = vadd.f32 %v155_v42, %v154_v40 }
  0xa4   :  { %v119_v12 = vrot.slane %v118_v11, 1 }
  0xa5   :  { %v157_v45 = vrot.slane %v156_v43, 1 }
  0xa6   :  { %v120_v14 = vmax.f32 %v118_v11, %v119_v12 }
  0xa7   :  { %v158_v49 = vadd.f32 %v157_v45, %v156_v43 }
  0xa8   :  { %v121_v15 = vsub.f32 %v84_v3, %v120_v14  ;;  %v122_v16 = vsub.f32 %v85_v4, %v120_v14 }
  0xaa   :  { %v123_v18 = vmul.f32 1.442695, %v121_v15  ;;  %v125_v19 = vmul.f32 1.442695, %v122_v16 }
  0xac   :  { %195 = vpow2.f32 %v123_v18 }
  0xad   :  { %197 = vpow2.f32 %v125_v19 }
  0xb6   :  { %v196_v24 = vpop.eup %195 }
  0xb7   :  { %v198_v26 = vpop.eup %197  ;;  %v127_v27 = vsel %vm110_vm1, %v196_v24, 0.0 }
  0xb8   :  { %v128_v29 = vsel %vm64_vm0, %v198_v26, 0.0 }
  0xb9   :  { %v129_v30 = vadd.f32 %v128_v29, %v127_v27 }
  0xbb   :  { %v130_v33 = vrot.slane %v129_v30, 4 }
  0xbd   :  { %v131_v35 = vadd.f32 %v130_v33, %v129_v30 }
  0xbf   :  { %v132_v36 = vrot.slane %v131_v35, 2 }
  0xc1   :  { %v133_v38 = vadd.f32 %v132_v36, %v131_v35 }
  0xc3   :  { %v134_v39 = vrot.slane %v133_v38, 1 }
  0xc5   :  { %v135_v41 = vadd.f32 %v134_v39, %v133_v38 }
  0xc7   :  { %199 = vlog2.f32 %v135_v41 }
  0xd1   :  { %v200_v46 = vpop.eup %199 }
  0xd2   :  { %v137_v47 = vmul.f32 0.6931472, %v200_v46 }
  0xd4   :  { %v138_v48 = vadd.f32 %v137_v47, %v120_v14 }
  0xd6   :  { %v159_v50 = vsub.f32 %v138_v48, %v158_v49 }
  0xd8   :  { %v160_v51 = vsel %vm109_vm6, %v159_v50, 0.0 }
  0xd9   :  { %v161_v52 = vsub.f32 0.0, %v160_v51 }
  0xdb   :  { %v162_v53 = vmul.f32 1.442695, %v161_v52 }
  0xdd   :  { %201 = vpow2.f32 %v162_v53 }
  0xe7   :  { %v202_v54 = vpop.eup %201 }
  0xe8   :  { %v164_v55 = vsub.f32 1.0, %v202_v54 }
  0xea   :  { %v165_v56 = vmul.f32 %v164_v55, %v164_v55 }
  0xec   :  { %v167_v58 = vmul.f32 %v165_v56, %v160_v51 }
  0xee   :  { %v168_v59 = vadd.f32 %v167_v58, %v166_v57 }
  0xf0   :  { %169 = vst.msk [vmem:[#allocation5] sm:$0x1] %vm64_vm0, %v168_v59 }
  0xf1   :  { %236 = shalt.err (!%p233_p12)
}
  0xf2   :  { %s237_s29 = scalar_lea.hbm %s308_s2, 16 }
  0xf3   :  { %p238_p13 = scmp.ne.s32.totalorder %s308_s2, %s237_s29  ;;  %p241_p0 = scmp.lt.u32.totalorder %s237_s29, %s308_s2 }
  0xf5   :  { %p243_p1 = pnand %p241_p0, %p238_p13 }
  0xf7   :  { %246 = shalt.err (!%p243_p1)
}
  0xf8   :  { %179 = dma.vmem_to_hbm [thread:$0]  %s177_s24, 16, %s308_s2, [#allocation4]  }
  0xf9   :  { %249 = dma.done.wait [#allocation4], 16  }
  0xfa   :  { %250 = vsyncadd [#allocation4], 4294967280 }
  0xfb   :  { %183 = vsyncpa [#allocation3], 1 }
  0xfc   :  { %184 = vsyncpa [#allocation4], 1 }

</bundles_post_ra>
